<compile_context>
chip_gen: v7x
topology: tpu7x:2x2x1
jax: 0.10.0
libtpu: 0.0.40
codegen_flags: <defaults>
</compile_context>

<pallas_src>
import functools
import math

import jax
import jax.numpy as jnp
from jax.experimental import pallas as pl
from jax.experimental.pallas import tpu as pltpu


def _vmem_limit_bytes():
    """80% of per-core VMEM, capped; conservative fallback if query fails."""
    try:
        cap = int(pltpu.get_tpu_info().vmem_capacity_bytes)
        return min(max(32 * 1024 * 1024, int(cap * 0.8)), 110 * 1024 * 1024)
    except Exception:
        return 48 * 1024 * 1024


def _pick_tile(n, candidates):
    """Largest candidate tile that divides n, else the full extent."""
    for c in candidates:
        if n >= c and n % c == 0:
            return c
    return n


def _attn_tile(seq, heads):
    """Flash q/kv tile: keep the stacked (heads*t, t) f32 score block <= ~8 MiB."""
    for c in (512, 256, 128):
        if seq % c == 0 and heads * c * c * 4 <= (8 << 20):
            return c
    return _pick_tile(seq, (128, 64, 32, 16, 8))


def _head_group(heads, head_dim, max_cols=512):
    """Heads per Q-projection step so the MXU N-dim is wide but Wq block stays small."""
    g = 1
    for cand in range(1, heads + 1):
        if heads % cand == 0 and cand * head_dim <= max_cols:
            g = cand
    return g


def _fit_hidden_tile(ts, dim, hidden, budget):
    """Largest FFN hidden tile whose estimated VMEM footprint fits the budget."""
    for th in (1024, 512, 256, 128):
        if hidden % th:
            continue
        need = (2 * ts * dim * 2       # x1 blocks (bf16, double-buffered)
                + 2 * dim * th * 2     # w1 blocks (bf16)
                + 2 * th * dim * 2     # w2 blocks (bf16)
                + 2 * ts * dim * 4     # out blocks (f32)
                + ts * dim * 4         # f32 accumulator scratch
                + 2 * ts * th * 4)     # hidden activation temporaries
        if need <= budget:
            return th
    return _pick_tile(hidden, (128, 64, 32, 16, 8))


# ---------------------------------------------------------------------------
# Kernel 1: LayerNorm + fused Q/K/V projection.
#   grid = (B, S/ts, head_groups); LN + shared K/V only at hg == 0; the normed
#   activations are re-read from the resident xn output block for every
#   head-group Q matmul; Q is written head-major (B, heads, S, hd).
# ---------------------------------------------------------------------------
def _ln_qkv_kernel(x_ref, gamma_ref, beta_ref, wq_ref, bq_ref, wk_ref, bk_ref,
                   wv_ref, bv_ref, xn_ref, q_ref, k_ref, v_ref,
                   *, group, head_dim):
    hg = pl.program_id(2)

    @pl.when(hg == 0)
    def _():
        x = x_ref[0].astype(jnp.float32)
        mean = jnp.mean(x, axis=-1, keepdims=True)
        var = jnp.mean(jnp.square(x - mean), axis=-1, keepdims=True)
        xn = (x - mean) * jax.lax.rsqrt(var + 1e-5)
        xn = xn * gamma_ref[0] + beta_ref[0]
        xn_ref[0] = xn.astype(xn_ref.dtype)                 # bf16 residual path
        xb = xn.astype(jnp.bfloat16)
        # NOTE: wk/bk are pre-scaled by 1/sqrt(head_dim) on the host.
        k_ref[0] = (jnp.dot(xb, wk_ref[...], preferred_element_type=jnp.float32)
                    + bk_ref[0]).astype(k_ref.dtype)
        v_ref[0] = (jnp.dot(xb, wv_ref[...], preferred_element_type=jnp.float32)
                    + bv_ref[0]).astype(v_ref.dtype)

    # Q for this head group; xn is read back from the resident output block
    # (written at hg == 0, persists across the "arbitrary" hg axis).
    xb = xn_ref[0]                                           # bf16 already
    qg = (jnp.dot(xb, wq_ref[0], preferred_element_type=jnp.float32)
          + bq_ref[0]).astype(q_ref.dtype)                   # (ts, group*hd)
    for hh in range(group):                                  # head-major store
        q_ref[0, hh] = qg[:, hh * head_dim:(hh + 1) * head_dim]


# ---------------------------------------------------------------------------
# Kernel 2: causal multi-query flash attention with stacked-head matmuls.
#   q_tile == kv_tile; kv tiles above the diagonal are skipped (and their K/V
#   index_map is clamped so no DMA is issued for them either).
# ---------------------------------------------------------------------------
def _flash_mqa_kernel(q_ref, k_ref, v_ref, o_ref, m_sc, l_sc, acc_sc,
                      *, heads, head_dim, q_tile):
    qi = pl.program_id(1)
    ki = pl.program_id(2)
    rows = heads * q_tile

    @pl.when(ki == 0)
    def _():
        m_sc[...] = jnp.full_like(m_sc, -jnp.inf)
        l_sc[...] = jnp.zeros_like(l_sc)
        acc_sc[...] = jnp.zeros_like(acc_sc)

    def update(masked):
        q = q_ref[0].reshape(rows, head_dim)     # (H*Tq, hd) bf16, stacked heads
        k = k_ref[0]                             # (Tkv, hd)  bf16 (pre-scaled)
        v = v_ref[0]                             # (Tkv, hd)  bf16
        s = jax.lax.dot_general(q, k, (((1,), (1,)), ((), ())),
                                preferred_element_type=jnp.float32)  # (H*Tq, Tkv)
        if masked:
            # Diagonal tile (ki == qi and q_tile == kv_tile): local-index mask.
            r = jax.lax.broadcasted_iota(jnp.int32, (rows, q_tile), 0) % q_tile
            c = jax.lax.broadcasted_iota(jnp.int32, (rows, q_tile), 1)
            s = jnp.where(c <= r, s, jnp.float32(-1e30))
        m_prev = m_sc[...]
        m_new = jnp.maximum(m_prev, jnp.max(s, axis=-1, keepdims=True))
        alpha = jnp.exp(m_prev - m_new)
        p = jnp.exp(s - m_new)
        l_sc[...] = alpha * l_sc[...] + jnp.sum(p, axis=-1, keepdims=True)
        acc_sc[...] = alpha * acc_sc[...] + jnp.dot(
            p.astype(v.dtype), v, preferred_element_type=jnp.float32)
        m_sc[...] = m_new

    @pl.when(ki < qi)                 # interior tile: fully unmasked fast path
    def _():
        update(masked=False)

    @pl.when(ki == qi)                # diagonal tile: apply causal mask
    def _():
        update(masked=True)

    @pl.when(ki == pl.num_programs(2) - 1)
    def _():
        inv = pl.reciprocal(l_sc[...], approx=True)          # EUP slot; ~free
        for h in range(heads):                               # direct per-head store
            lo = h * q_tile
            o_ref[0, :, h * head_dim:(h + 1) * head_dim] = (
                acc_sc[lo:lo + q_tile] * inv[lo:lo + q_tile]).astype(o_ref.dtype)


# ---------------------------------------------------------------------------
# Kernel 3: attention out-projection + residual onto xn (Wo column-tiled).
# ---------------------------------------------------------------------------
def _linear_residual_kernel(x_ref, res_ref, w_ref, b_ref, o_ref):
    y = jnp.dot(x_ref[0], w_ref[...], preferred_element_type=jnp.float32) + b_ref[0]
    o_ref[0] = (y + res_ref[0].astype(jnp.float32)).astype(o_ref.dtype)


# ---------------------------------------------------------------------------
# Kernel 4: FeedForward, hidden(4D) reduction-tiled, f32 accumulator, residual.
# ---------------------------------------------------------------------------
def _ffn_kernel(x1_ref, w1_ref, b1_ref, w2_ref, b2_ref, o_ref, acc_sc):
    hi = pl.program_id(2)

    @pl.when(hi == 0)
    def _():
        acc_sc[...] = jnp.zeros_like(acc_sc)

    h = jnp.dot(x1_ref[0], w1_ref[...],
                preferred_element_type=jnp.float32) + b1_ref[0]
    h = jax.nn.gelu(h, approximate=False)        # exact (erf) GELU, like nn.GELU()
    acc_sc[...] += jnp.dot(h.astype(jnp.bfloat16), w2_ref[...],
                           preferred_element_type=jnp.float32)

    @pl.when(hi == pl.num_programs(2) - 1)
    def _():
        o_ref[0] = (acc_sc[...] + b2_ref[0]
                    + x1_ref[0].astype(jnp.float32)).astype(o_ref.dtype)


# ---------------------------------------------------------------------------
# Wrapper: the whole transformer block.
# ---------------------------------------------------------------------------
def long_gemini_block(x, params, *, heads):
    B, S, D = x.shape
    head_dim = D // heads
    hidden = 4 * D
    f32, bf16 = jnp.float32, jnp.bfloat16

    vmem_limit = _vmem_limit_bytes()
    ts = _pick_tile(S, (512, 256, 128))                 # sequence tile (linears/LN)
    ta = _attn_tile(S, heads)                           # flash q == kv tile
    td = _pick_tile(D, (512, 256, 128))                 # output-column tile
    th = _fit_hidden_tile(ts, D, hidden, int(0.7 * vmem_limit))
    group = _head_group(heads, head_dim)                # heads per Q-proj step
    n_hg = heads // group

    def cp(sem):
        return pltpu.CompilerParams(dimension_semantics=sem,
                                    vmem_limit_bytes=vmem_limit)

    # Head-grouped Wq / bq layouts: (n_hg, D, group*hd) / (n_hg, 1, group*hd).
    wq_g = params["wq"].reshape(D, n_hg, group * head_dim).transpose(1, 0, 2)
    bq_g = params["bq"].reshape(n_hg, 1, group * head_dim)

    # ---- 1) LayerNorm + fused Q/K/V projection ----
    xn, q, k, v = pl.pallas_call(
        functools.partial(_ln_qkv_kernel, group=group, head_dim=head_dim),
        out_shape=(jax.ShapeDtypeStruct((B, S, D), bf16),                 # xn
                   jax.ShapeDtypeStruct((B, heads, S, head_dim), bf16),   # q (head-major)
                   jax.ShapeDtypeStruct((B, S, head_dim), bf16),          # k (pre-scaled)
                   jax.ShapeDtypeStruct((B, S, head_dim), bf16)),         # v
        grid=(B, S // ts, n_hg),
        in_specs=[
            pl.BlockSpec((1, ts, D), lambda b, s, h: (b, s, 0)),
            pl.BlockSpec((1, D), lambda b, s, h: (0, 0)),
            pl.BlockSpec((1, D), lambda b, s, h: (0, 0)),
            pl.BlockSpec((1, D, group * head_dim), lambda b, s, h: (h, 0, 0)),
            pl.BlockSpec((1, 1, group * head_dim), lambda b, s, h: (h, 0, 0)),
            pl.BlockSpec((D, head_dim), lambda b, s, h: (0, 0)),
            pl.BlockSpec((1, head_dim), lambda b, s, h: (0, 0)),
            pl.BlockSpec((D, head_dim), lambda b, s, h: (0, 0)),
            pl.BlockSpec((1, head_dim), lambda b, s, h: (0, 0)),
        ],
        out_specs=(pl.BlockSpec((1, ts, D), lambda b, s, h: (b, s, 0)),
                   pl.BlockSpec((1, group, ts, head_dim), lambda b, s, h: (b, h, s, 0)),
                   pl.BlockSpec((1, ts, head_dim), lambda b, s, h: (b, s, 0)),
                   pl.BlockSpec((1, ts, head_dim), lambda b, s, h: (b, s, 0))),
        compiler_params=cp(("parallel", "parallel", "arbitrary")),
    )(x, params["gamma"], params["beta"], wq_g, bq_g,
      params["wk"], params["bk"], params["wv"], params["bv"])

    # ---- 2) causal flash multi-query attention (stacked heads) ----
    ctx = pl.pallas_call(
        functools.partial(_flash_mqa_kernel, heads=heads, head_dim=head_dim,
                          q_tile=ta),
        out_shape=jax.ShapeDtypeStruct((B, S, D), bf16),
        grid=(B, S // ta, S // ta),
        in_specs=[
            pl.BlockSpec((1, heads, ta, head_dim), lambda b, qi, ki: (b, 0, qi, 0)),
            # clamp: skipped (ki > qi) steps re-use the previous K/V block -> no DMA
            pl.BlockSpec((1, ta, head_dim),
                         lambda b, qi, ki: (b, jnp.minimum(ki, qi), 0)),
            pl.BlockSpec((1, ta, head_dim),
                         lambda b, qi, ki: (b, jnp.minimum(ki, qi), 0)),
        ],
        out_specs=pl.BlockSpec((1, ta, D), lambda b, qi, ki: (b, qi, 0)),
        scratch_shapes=[
            pltpu.VMEM((heads * ta, 1), f32),           # running max
            pltpu.VMEM((heads * ta, 1), f32),           # running denom
            pltpu.VMEM((heads * ta, head_dim), f32),    # running weighted values
        ],
        compiler_params=cp(("parallel", "parallel", "arbitrary")),
    )(q, k, v)

    # ---- 3) attention out-projection + residual onto xn (Wo column-tiled) ----
    x1 = pl.pallas_call(
        _linear_residual_kernel,
        out_shape=jax.ShapeDtypeStruct((B, S, D), bf16),
        grid=(B, S // ts, D // td),
        in_specs=[
            pl.BlockSpec((1, ts, D), lambda b, s, d: (b, s, 0)),    # ctx (bf16)
            pl.BlockSpec((1, ts, td), lambda b, s, d: (b, s, d)),   # xn residual cols
            pl.BlockSpec((D, td), lambda b, s, d: (0, d)),          # Wo tile
            pl.BlockSpec((1, td), lambda b, s, d: (0, d)),          # bo tile
        ],
        out_specs=pl.BlockSpec((1, ts, td), lambda b, s, d: (b, s, d)),
        compiler_params=cp(("parallel", "parallel", "parallel")),
    )(ctx, xn, params["wo"], params["bo"])

    # ---- 4) FFN (hidden-dim tiled reduction) + residual onto x1 ----
    out = pl.pallas_call(
        _ffn_kernel,
        out_shape=jax.ShapeDtypeStruct((B, S, D), x.dtype),
        grid=(B, S // ts, hidden // th),
        in_specs=[
            pl.BlockSpec((1, ts, D), lambda b, s, h: (b, s, 0)),
            pl.BlockSpec((D, th), lambda b, s, h: (0, h)),
            pl.BlockSpec((1, th), lambda b, s, h: (0, h)),
            pl.BlockSpec((th, D), lambda b, s, h: (h, 0)),
            pl.BlockSpec((1, D), lambda b, s, h: (0, 0)),
        ],
        out_specs=pl.BlockSpec((1, ts, D), lambda b, s, h: (b, s, 0)),
        scratch_shapes=[pltpu.VMEM((ts, D), f32)],
        compiler_params=cp(("parallel", "parallel", "arbitrary")),
    )(x1, params["w1"], params["b1"], params["w2"], params["b2"])

    return out


# ---------------------------------------------------------------------------
# Parameters (synthetic; fused Wqkv built then split, attn scale folded into K).
# ---------------------------------------------------------------------------
def init_params(key, dim, heads):
    head_dim = dim // heads
    hidden = 4 * dim
    qkv_out = dim + 2 * head_dim
    ks = jax.random.split(key, 8)
    f32, bf16 = jnp.float32, jnp.bfloat16

    def lin(k, fan_in, fan_out):
        return jax.random.normal(k, (fan_in, fan_out), f32) * (1.0 / math.sqrt(fan_in))

    wqkv = lin(ks[0], dim, qkv_out)                      # fused [Q | K | V] layout
    bqkv = jax.random.normal(ks[1], (1, qkv_out), f32) * 0.02
    scale = 1.0 / math.sqrt(head_dim)                    # folded into K once, host side

    return {
        "gamma": jnp.ones((1, dim), f32),
        "beta": jnp.zeros((1, dim), f32),
        "wq": wqkv[:, :dim].astype(bf16),
        "bq": bqkv[:, :dim],
        "wk": (wqkv[:, dim:dim + head_dim] * scale).astype(bf16),
        "bk": bqkv[:, dim:dim + head_dim] * scale,
        "wv": wqkv[:, dim + head_dim:].astype(bf16),
        "bv": bqkv[:, dim + head_dim:],
        "wo": lin(ks[2], dim, dim).astype(bf16),
        "bo": jax.random.normal(ks[3], (1, dim), f32) * 0.02,
        "w1": lin(ks[4], dim, hidden).astype(bf16),
        "b1": jax.random.normal(ks[5], (1, hidden), f32) * 0.02,
        "w2": lin(ks[6], hidden, dim).astype(bf16),
        "b2": jax.random.normal(ks[7], (1, dim), f32) * 0.02,
    }


if __name__ == "__main__":
    B, S, D, H = 2, 8, 32, 4          # batch, seq, dim, heads  (head_dim = 8)
    key = jax.random.PRNGKey(0)
    kx, kp = jax.random.split(key)
    x = jax.random.normal(kx, (B, S, D), jnp.float32)
    params = init_params(kp, D, H)

    out = long_gemini_block(x, params, heads=H)
    jax.block_until_ready(out)
    assert out.shape == (B, S, D)
    assert bool(jnp.all(jnp.isfinite(out)))
    print("KERNEL_OK")
</pallas_src>

<mosaic_0001>
module attributes {stable_mosaic.version = 11 : i64} {
  func.func @_ln_qkv_kernel(%arg0: i32, %arg1: i32, %arg2: i32, %arg3: memref<1x8x32xf32, #tpu.memory_space<vmem>>, %arg4: memref<1x32xf32, #tpu.memory_space<vmem>>, %arg5: memref<1x32xf32, #tpu.memory_space<vmem>>, %arg6: memref<1x32x32xbf16, #tpu.memory_space<vmem>>, %arg7: memref<1x1x32xf32, #tpu.memory_space<vmem>>, %arg8: memref<32x8xbf16, #tpu.memory_space<vmem>>, %arg9: memref<1x8xf32, #tpu.memory_space<vmem>>, %arg10: memref<32x8xbf16, #tpu.memory_space<vmem>>, %arg11: memref<1x8xf32, #tpu.memory_space<vmem>>, %arg12: memref<1x8x32xbf16, #tpu.memory_space<vmem>>, %arg13: memref<1x4x8x8xbf16, #tpu.memory_space<vmem>>, %arg14: memref<1x8x8xbf16, #tpu.memory_space<vmem>>, %arg15: memref<1x8x8xbf16, #tpu.memory_space<vmem>>) attributes {dimension_semantics = [#tpu.dimension_semantics<parallel>, #tpu.dimension_semantics<parallel>, #tpu.dimension_semantics<arbitrary>], iteration_bounds = array<i64: 2, 1, 1>, scalar_prefetch = 0 : i64, scratch_operands = 0 : i64, tpu.core_type = #tpu.core_type<tc>, window_params = [{transform_indices = @transform_0, window_bounds = array<i64: 1, 8, 32>}, {pipeline_mode = #tpu.pipeline_mode<synchronous>, transform_indices = @transform_1, window_bounds = array<i64: 1, 32>}, {pipeline_mode = #tpu.pipeline_mode<synchronous>, transform_indices = @transform_2, window_bounds = array<i64: 1, 32>}, {transform_indices = @transform_3, window_bounds = array<i64: 1, 32, 32>}, {transform_indices = @transform_4, window_bounds = array<i64: 1, 1, 32>}, {pipeline_mode = #tpu.pipeline_mode<synchronous>, transform_indices = @transform_5, window_bounds = array<i64: 32, 8>}, {pipeline_mode = #tpu.pipeline_mode<synchronous>, transform_indices = @transform_6, window_bounds = array<i64: 1, 8>}, {pipeline_mode = #tpu.pipeline_mode<synchronous>, transform_indices = @transform_7, window_bounds = array<i64: 32, 8>}, {pipeline_mode = #tpu.pipeline_mode<synchronous>, transform_indices = @transform_8, window_bounds = array<i64: 1, 8>}, {transform_indices = @transform_9, window_bounds = array<i64: 1, 8, 32>}, {transform_indices = @transform_10, window_bounds = array<i64: 1, 4, 8, 8>}, {transform_indices = @transform_11, window_bounds = array<i64: 1, 8, 8>}, {transform_indices = @transform_12, window_bounds = array<i64: 1, 8, 8>}]} {
    %c0_i32 = arith.constant 0 : i32
    %0 = arith.cmpi eq, %arg2, %c0_i32 : i32
    %1 = arith.extui %0 : i1 to i32
    %c0_i32_0 = arith.constant 0 : i32
    %2 = arith.cmpi ne, %1, %c0_i32_0 : i32
    scf.if %2 {
      %c0_22 = arith.constant 0 : index
      %c0_23 = arith.constant 0 : index
      %c0_24 = arith.constant 0 : index
      %29 = vector.load %arg3[%c0_22, %c0_23, %c0_24] : memref<1x8x32xf32, #tpu.memory_space<vmem>>, vector<1x8x32xf32>
      %30 = vector.shape_cast %29 : vector<1x8x32xf32> to vector<8x32xf32>
      %cst_25 = arith.constant dense<0.000000e+00> : vector<8xf32>
      %31 = vector.multi_reduction <add>, %30, %cst_25 [1] : vector<8x32xf32> to vector<8xf32>
      %32 = vector.shape_cast %31 : vector<8xf32> to vector<8x1xf32>
      %cst_26 = arith.constant 3.200000e+01 : f32
      %33 = vector.broadcast %cst_26 : f32 to vector<8x1xf32>
      %34 = arith.divf %32, %33 : vector<8x1xf32>
      %35 = vector.broadcast %34 : vector<8x1xf32> to vector<8x32xf32>
      %36 = arith.subf %30, %35 : vector<8x32xf32>
      %37 = arith.mulf %36, %36 : vector<8x32xf32>
      %cst_27 = arith.constant dense<0.000000e+00> : vector<8xf32>
      %38 = vector.multi_reduction <add>, %37, %cst_27 [1] : vector<8x32xf32> to vector<8xf32>
      %39 = vector.shape_cast %38 : vector<8xf32> to vector<8x1xf32>
      %cst_28 = arith.constant 3.200000e+01 : f32
      %40 = vector.broadcast %cst_28 : f32 to vector<8x1xf32>
      %41 = arith.divf %39, %40 : vector<8x1xf32>
      %42 = vector.broadcast %34 : vector<8x1xf32> to vector<8x32xf32>
      %43 = arith.subf %30, %42 : vector<8x32xf32>
      %cst_29 = arith.constant 9.99999974E-6 : f32
      %44 = vector.broadcast %cst_29 : f32 to vector<8x1xf32>
      %45 = arith.addf %41, %44 : vector<8x1xf32>
      %46 = math.rsqrt %45 : vector<8x1xf32>
      %47 = vector.broadcast %46 : vector<8x1xf32> to vector<8x32xf32>
      %48 = arith.mulf %43, %47 : vector<8x32xf32>
      %c0_30 = arith.constant 0 : index
      %c0_31 = arith.constant 0 : index
      %49 = vector.load %arg4[%c0_30, %c0_31] : memref<1x32xf32, #tpu.memory_space<vmem>>, vector<1x32xf32>
      %50 = vector.shape_cast %49 : vector<1x32xf32> to vector<32xf32>
      %51 = vector.shape_cast %50 : vector<32xf32> to vector<1x32xf32>
      %52 = vector.broadcast %51 : vector<1x32xf32> to vector<8x32xf32>
      %53 = arith.mulf %48, %52 : vector<8x32xf32>
      %c0_32 = arith.constant 0 : index
      %c0_33 = arith.constant 0 : index
      %54 = vector.load %arg5[%c0_32, %c0_33] : memref<1x32xf32, #tpu.memory_space<vmem>>, vector<1x32xf32>
      %55 = vector.shape_cast %54 : vector<1x32xf32> to vector<32xf32>
      %56 = vector.shape_cast %55 : vector<32xf32> to vector<1x32xf32>
      %57 = vector.broadcast %56 : vector<1x32xf32> to vector<8x32xf32>
      %58 = arith.addf %53, %57 : vector<8x32xf32>
      %59 = arith.truncf %58 : vector<8x32xf32> to vector<8x32xbf16>
      %c0_34 = arith.constant 0 : index
      %c0_35 = arith.constant 0 : index
      %c0_36 = arith.constant 0 : index
      %60 = vector.load %arg12[%c0_34, %c0_35, %c0_36] : memref<1x8x32xbf16, #tpu.memory_space<vmem>>, vector<1x8x32xbf16>
      %61 = vector.shape_cast %60 : vector<1x8x32xbf16> to vector<8x32xbf16>
      %62 = vector.shape_cast %59 : vector<8x32xbf16> to vector<1x8x32xbf16>
      tpu.vector_store %arg12[%c0_34, %c0_35, %c0_36], %62 {strides = array<i32>} : memref<1x8x32xbf16, #tpu.memory_space<vmem>>, vector<1x8x32xbf16>,
      %63 = arith.truncf %58 : vector<8x32xf32> to vector<8x32xbf16>
      %c0_37 = arith.constant 0 : index
      %c0_38 = arith.constant 0 : index
      %64 = vector.load %arg8[%c0_37, %c0_38] : memref<32x8xbf16, #tpu.memory_space<vmem>>, vector<32x8xbf16>
      %cst_39 = arith.constant dense<0.000000e+00> : vector<8x8xf32>
      %65 = tpu.matmul %63, %64, %cst_39 {dimension_numbers = #tpu.dot_dimension_numbers<[1], [0], [0], [1], [0, 0, 1, 1], [], []>} : vector<8x32xbf16>, vector<32x8xbf16>, vector<8x8xf32> -> vector<8x8xf32>
      %c0_40 = arith.constant 0 : index
      %c0_41 = arith.constant 0 : index
      %66 = vector.load %arg9[%c0_40, %c0_41] : memref<1x8xf32, #tpu.memory_space<vmem>>, vector<1x8xf32>
      %67 = vector.shape_cast %66 : vector<1x8xf32> to vector<8xf32>
      %68 = vector.shape_cast %67 : vector<8xf32> to vector<1x8xf32>
      %69 = vector.broadcast %68 : vector<1x8xf32> to vector<8x8xf32>
      %70 = arith.addf %65, %69 : vector<8x8xf32>
      %71 = arith.truncf %70 : vector<8x8xf32> to vector<8x8xbf16>
      %c0_42 = arith.constant 0 : index
      %c0_43 = arith.constant 0 : index
      %c0_44 = arith.constant 0 : index
      %72 = vector.load %arg14[%c0_42, %c0_43, %c0_44] : memref<1x8x8xbf16, #tpu.memory_space<vmem>>, vector<1x8x8xbf16>
      %73 = vector.shape_cast %72 : vector<1x8x8xbf16> to vector<8x8xbf16>
      %74 = vector.shape_cast %71 : vector<8x8xbf16> to vector<1x8x8xbf16>
      tpu.vector_store %arg14[%c0_42, %c0_43, %c0_44], %74 {strides = array<i32>} : memref<1x8x8xbf16, #tpu.memory_space<vmem>>, vector<1x8x8xbf16>,
      %c0_45 = arith.constant 0 : index
      %c0_46 = arith.constant 0 : index
      %75 = vector.load %arg10[%c0_45, %c0_46] : memref<32x8xbf16, #tpu.memory_space<vmem>>, vector<32x8xbf16>
      %cst_47 = arith.constant dense<0.000000e+00> : vector<8x8xf32>
      %76 = tpu.matmul %63, %75, %cst_47 {dimension_numbers = #tpu.dot_dimension_numbers<[1], [0], [0], [1], [0, 0, 1, 1], [], []>} : vector<8x32xbf16>, vector<32x8xbf16>, vector<8x8xf32> -> vector<8x8xf32>
      %c0_48 = arith.constant 0 : index
      %c0_49 = arith.constant 0 : index
      %77 = vector.load %arg11[%c0_48, %c0_49] : memref<1x8xf32, #tpu.memory_space<vmem>>, vector<1x8xf32>
      %78 = vector.shape_cast %77 : vector<1x8xf32> to vector<8xf32>
      %79 = vector.shape_cast %78 : vector<8xf32> to vector<1x8xf32>
      %80 = vector.broadcast %79 : vector<1x8xf32> to vector<8x8xf32>
      %81 = arith.addf %76, %80 : vector<8x8xf32>
      %82 = arith.truncf %81 : vector<8x8xf32> to vector<8x8xbf16>
      %c0_50 = arith.constant 0 : index
      %c0_51 = arith.constant 0 : index
      %c0_52 = arith.constant 0 : index
      %83 = vector.load %arg15[%c0_50, %c0_51, %c0_52] : memref<1x8x8xbf16, #tpu.memory_space<vmem>>, vector<1x8x8xbf16>
      %84 = vector.shape_cast %83 : vector<1x8x8xbf16> to vector<8x8xbf16>
      %85 = vector.shape_cast %82 : vector<8x8xbf16> to vector<1x8x8xbf16>
      tpu.vector_store %arg15[%c0_50, %c0_51, %c0_52], %85 {strides = array<i32>} : memref<1x8x8xbf16, #tpu.memory_space<vmem>>, vector<1x8x8xbf16>,
    } else {
    }
    %c0 = arith.constant 0 : index
    %c0_1 = arith.constant 0 : index
    %c0_2 = arith.constant 0 : index
    %3 = vector.load %arg12[%c0, %c0_1, %c0_2] : memref<1x8x32xbf16, #tpu.memory_space<vmem>>, vector<1x8x32xbf16>
    %4 = vector.shape_cast %3 : vector<1x8x32xbf16> to vector<8x32xbf16>
    %c0_3 = arith.constant 0 : index
    %c0_4 = arith.constant 0 : index
    %c0_5 = arith.constant 0 : index
    %5 = vector.load %arg6[%c0_3, %c0_4, %c0_5] : memref<1x32x32xbf16, #tpu.memory_space<vmem>>, vector<1x32x32xbf16>
    %6 = vector.shape_cast %5 : vector<1x32x32xbf16> to vector<32x32xbf16>
    %cst = arith.constant dense<0.000000e+00> : vector<8x32xf32>
    %7 = tpu.matmul %4, %6, %cst {dimension_numbers = #tpu.dot_dimension_numbers<[1], [0], [0], [1], [0, 0, 1, 1], [], []>} : vector<8x32xbf16>, vector<32x32xbf16>, vector<8x32xf32> -> vector<8x32xf32>
    %c0_6 = arith.constant 0 : index
    %c0_7 = arith.constant 0 : index
    %c0_8 = arith.constant 0 : index
    %8 = vector.load %arg7[%c0_6, %c0_7, %c0_8] : memref<1x1x32xf32, #tpu.memory_space<vmem>>, vector<1x1x32xf32>
    %9 = vector.shape_cast %8 : vector<1x1x32xf32> to vector<1x32xf32>
    %10 = vector.broadcast %9 : vector<1x32xf32> to vector<8x32xf32>
    %11 = arith.addf %7, %10 : vector<8x32xf32>
    %12 = arith.truncf %11 : vector<8x32xf32> to vector<8x32xbf16>
    %13 = vector.extract_strided_slice %12 {offsets = [0, 0], sizes = [8, 8], strides = [1, 1]} : vector<8x32xbf16> to vector<8x8xbf16>
    %c0_9 = arith.constant 0 : index
    %c0_10 = arith.constant 0 : index
    %c0_11 = arith.constant 0 : index
    %c0_12 = arith.constant 0 : index
    %14 = vector.load %arg13[%c0_9, %c0_10, %c0_11, %c0_12] : memref<1x4x8x8xbf16, #tpu.memory_space<vmem>>, vector<1x1x8x8xbf16>
    %15 = vector.shape_cast %14 : vector<1x1x8x8xbf16> to vector<8x8xbf16>
    %16 = vector.shape_cast %13 : vector<8x8xbf16> to vector<1x1x8x8xbf16>
    tpu.vector_store %arg13[%c0_9, %c0_10, %c0_11, %c0_12], %16 {strides = array<i32>} : memref<1x4x8x8xbf16, #tpu.memory_space<vmem>>, vector<1x1x8x8xbf16>,
    %17 = vector.extract_strided_slice %12 {offsets = [0, 8], sizes = [8, 8], strides = [1, 1]} : vector<8x32xbf16> to vector<8x8xbf16>
    %c0_13 = arith.constant 0 : index
    %c1 = arith.constant 1 : index
    %c0_14 = arith.constant 0 : index
    %c0_15 = arith.constant 0 : index
    %18 = vector.load %arg13[%c0_13, %c1, %c0_14, %c0_15] : memref<1x4x8x8xbf16, #tpu.memory_space<vmem>>, vector<1x1x8x8xbf16>
    %19 = vector.shape_cast %18 : vector<1x1x8x8xbf16> to vector<8x8xbf16>
    %20 = vector.shape_cast %17 : vector<8x8xbf16> to vector<1x1x8x8xbf16>
    tpu.vector_store %arg13[%c0_13, %c1, %c0_14, %c0_15], %20 {strides = array<i32>} : memref<1x4x8x8xbf16, #tpu.memory_space<vmem>>, vector<1x1x8x8xbf16>,
    %21 = vector.extract_strided_slice %12 {offsets = [0, 16], sizes = [8, 8], strides = [1, 1]} : vector<8x32xbf16> to vector<8x8xbf16>
    %c0_16 = arith.constant 0 : index
    %c2 = arith.constant 2 : index
    %c0_17 = arith.constant 0 : index
    %c0_18 = arith.constant 0 : index
    %22 = vector.load %arg13[%c0_16, %c2, %c0_17, %c0_18] : memref<1x4x8x8xbf16, #tpu.memory_space<vmem>>, vector<1x1x8x8xbf16>
    %23 = vector.shape_cast %22 : vector<1x1x8x8xbf16> to vector<8x8xbf16>
    %24 = vector.shape_cast %21 : vector<8x8xbf16> to vector<1x1x8x8xbf16>
    tpu.vector_store %arg13[%c0_16, %c2, %c0_17, %c0_18], %24 {strides = array<i32>} : memref<1x4x8x8xbf16, #tpu.memory_space<vmem>>, vector<1x1x8x8xbf16>,
    %25 = vector.extract_strided_slice %12 {offsets = [0, 24], sizes = [8, 8], strides = [1, 1]} : vector<8x32xbf16> to vector<8x8xbf16>
    %c0_19 = arith.constant 0 : index
    %c3 = arith.constant 3 : index
    %c0_20 = arith.constant 0 : index
    %c0_21 = arith.constant 0 : index
    %26 = vector.load %arg13[%c0_19, %c3, %c0_20, %c0_21] : memref<1x4x8x8xbf16, #tpu.memory_space<vmem>>, vector<1x1x8x8xbf16>
    %27 = vector.shape_cast %26 : vector<1x1x8x8xbf16> to vector<8x8xbf16>
    %28 = vector.shape_cast %25 : vector<8x8xbf16> to vector<1x1x8x8xbf16>
    tpu.vector_store %arg13[%c0_19, %c3, %c0_20, %c0_21], %28 {strides = array<i32>} : memref<1x4x8x8xbf16, #tpu.memory_space<vmem>>, vector<1x1x8x8xbf16>,
    return
  }
  func.func @transform_0(%arg0: i32, %arg1: i32, %arg2: i32) -> (i32, i32, i32) {
    %c0_i32 = arith.constant 0 : i32
    %c0_i32_0 = arith.constant 0 : i32
    return %arg0, %arg1, %c0_i32 : i32, i32, i32
  }
  func.func @transform_1(%arg0: i32, %arg1: i32, %arg2: i32) -> (i32, i32) {
    %c0_i32 = arith.constant 0 : i32
    %c0_i32_0 = arith.constant 0 : i32
    %c0_i32_1 = arith.constant 0 : i32
    return %c0_i32, %c0_i32_0 : i32, i32
  }
  func.func @transform_2(%arg0: i32, %arg1: i32, %arg2: i32) -> (i32, i32) {
    %c0_i32 = arith.constant 0 : i32
    %c0_i32_0 = arith.constant 0 : i32
    %c0_i32_1 = arith.constant 0 : i32
    return %c0_i32, %c0_i32_0 : i32, i32
  }
  func.func @transform_3(%arg0: i32, %arg1: i32, %arg2: i32) -> (i32, i32, i32) {
    %c0_i32 = arith.constant 0 : i32
    %c0_i32_0 = arith.constant 0 : i32
    %c0_i32_1 = arith.constant 0 : i32
    return %arg2, %c0_i32, %c0_i32_0 : i32, i32, i32
  }
  func.func @transform_4(%arg0: i32, %arg1: i32, %arg2: i32) -> (i32, i32, i32) {
    %c0_i32 = arith.constant 0 : i32
    %c0_i32_0 = arith.constant 0 : i32
    %c0_i32_1 = arith.constant 0 : i32
    return %arg2, %c0_i32, %c0_i32_0 : i32, i32, i32
  }
  func.func @transform_5(%arg0: i32, %arg1: i32, %arg2: i32) -> (i32, i32) {
    %c0_i32 = arith.constant 0 : i32
    %c0_i32_0 = arith.constant 0 : i32
    %c0_i32_1 = arith.constant 0 : i32
    return %c0_i32, %c0_i32_0 : i32, i32
  }
  func.func @transform_6(%arg0: i32, %arg1: i32, %arg2: i32) -> (i32, i32) {
    %c0_i32 = arith.constant 0 : i32
    %c0_i32_0 = arith.constant 0 : i32
    %c0_i32_1 = arith.constant 0 : i32
    return %c0_i32, %c0_i32_0 : i32, i32
  }
  func.func @transform_7(%arg0: i32, %arg1: i32, %arg2: i32) -> (i32, i32) {
    %c0_i32 = arith.constant 0 : i32
    %c0_i32_0 = arith.constant 0 : i32
    %c0_i32_1 = arith.constant 0 : i32
    return %c0_i32, %c0_i32_0 : i32, i32
  }
  func.func @transform_8(%arg0: i32, %arg1: i32, %arg2: i32) -> (i32, i32) {
    %c0_i32 = arith.constant 0 : i32
    %c0_i32_0 = arith.constant 0 : i32
    %c0_i32_1 = arith.constant 0 : i32
    return %c0_i32, %c0_i32_0 : i32, i32
  }
  func.func @transform_9(%arg0: i32, %arg1: i32, %arg2: i32) -> (i32, i32, i32) {
    %c0_i32 = arith.constant 0 : i32
    %c0_i32_0 = arith.constant 0 : i32
    return %arg0, %arg1, %c0_i32 : i32, i32, i32
  }
  func.func @transform_10(%arg0: i32, %arg1: i32, %arg2: i32) -> (i32, i32, i32, i32) {
    %c0_i32 = arith.constant 0 : i32
    %c0_i32_0 = arith.constant 0 : i32
    return %arg0, %arg2, %arg1, %c0_i32 : i32, i32, i32, i32
  }
  func.func @transform_11(%arg0: i32, %arg1: i32, %arg2: i32) -> (i32, i32, i32) {
    %c0_i32 = arith.constant 0 : i32
    %c0_i32_0 = arith.constant 0 : i32
    return %arg0, %arg1, %c0_i32 : i32, i32, i32
  }
  func.func @transform_12(%arg0: i32, %arg1: i32, %arg2: i32) -> (i32, i32, i32) {
    %c0_i32 = arith.constant 0 : i32
    %c0_i32_0 = arith.constant 0 : i32
    return %arg0, %arg1, %c0_i32 : i32, i32, i32
  }
}

</mosaic_0001>

<bundles_post_ra>
// kernel: tpu_custom_call.1
= control target key start
LH: loop header
LB: loop body
LE: loop exit
PB: predicated region body
PF: predicated region fallthrough
CT: control target
= control target key end

     0   :  { %s1752_s0 = inlined_call_operand.vmem [shape: f32[2,8,32], index: 0, kind: input, shape index: {}]   ;;  %s1753_s1 = inlined_call_operand.vmem [shape: f32[1,32], index: 1, kind: input, shape index: {}]   ;;  %s1754_s2 = inlined_call_operand.vmem [shape: f32[1,32], index: 2, kind: input, shape index: {}]   ;;  %s1755_s3 = inlined_call_operand.vmem [shape: bf16[1,32,32], index: 3, kind: input, shape index: {}]   ;;  %s1756_s4 = inlined_call_operand.vmem [shape: f32[1,1,32], index: 4, kind: input, shape index: {}]   ;;  %s1757_s5 = inlined_call_operand.vmem [shape: bf16[32,8], index: 5, kind: input, shape index: {}]   ;;  %s1758_s6 = inlined_call_operand.vmem [shape: f32[1,8], index: 6, kind: input, shape index: {}]   ;;  %s1759_s7 = inlined_call_operand.vmem [shape: bf16[32,8], index: 7, kind: input, shape index: {}]   ;;  %s1760_s8 = inlined_call_operand.vmem [shape: f32[1,8], index: 8, kind: input, shape index: {}]   ;;  %s1761_s9 = inlined_call_operand.hbm [shape: bf16[2,8,32], index: 9, kind: output, shape index: {0}]   ;;  %s1762_s10 = inlined_call_operand.hbm [shape: bf16[2,4,8,8], index: 10, kind: output, shape index: {1}]   ;;  %s1763_s11 = inlined_call_operand.hbm [shape: bf16[2,8,8], index: 11, kind: output, shape index: {2}]   ;;  %s1764_s12 = inlined_call_operand.hbm [shape: bf16[2,8,8], index: 12, kind: output, shape index: {3}]  }
   0x1   :  { %1769 = sst [smem:[#allocation12_spill]] %s1752_s0 }
   0x2   :  { %1770 = sst [smem:[#allocation13_spill]] %s1753_s1 }
   0x3   :  { %1771 = sst [smem:[#allocation14_spill]] %s1754_s2 }
   0x4   :  { %1772 = sst [smem:[#allocation15_spill]] %s1755_s3 }
   0x5   :  { %1773 = sst [smem:[#allocation16_spill]] %s1756_s4 }
   0x6   :  { %1774 = sst [smem:[#allocation17_spill]] %s1757_s5 }
   0x7   :  { %1775 = sst [smem:[#allocation18_spill]] %s1758_s6 }
   0x8   :  { %18 = vsyncpa [#allocation3], 0 }
   0x9   :  { %20 = vsyncpa [#allocation3 + $0x1], 0 }
   0xa   :  { %21 = vsyncpa [#allocation5], 0 }
   0xb   :  { %23 = vsyncpa [#allocation5 + $0x1], 0 }
   0xc   :  { %24 = vsyncpa [#allocation8], 0 }
   0xd   :  { %26 = vsyncpa [#allocation8 + $0x1], 0  ;;  %s1461_s21 = smov 0   ;;  %s1463_s22 = smov 0  }
   0xe   :  { %s1465_s23 = smov 0   ;;  %s1467_s24 = smov 0  }
   0xf   :  { %s1469_s25 = smov 0   ;;  %s1471_s26 = smov 0  }
  0x10 LB: > { %s1766_s27 = sadd.s32 4294967295, %s1383_s26   ;;  %s1765_s28 = sadd.s32 4294967294, %s1383_s26   ;;  %s1383_s26 = sphi %s1471_s26, %s32_s26   ;;  %s1379_s25 = sphi %s1469_s25, %s1794_s25   ;;  %s1375_s24 = sphi %s1467_s24, %s1793_s24   ;;  %s1371_s23 = sphi %s1465_s23, %s1792_s23   ;;  %s1367_s22 = sphi %s1463_s22, %s1791_s22   ;;  %s1363_s21 = sphi %s1461_s21, %s1790_s21  }
  0x11   : > { %s51_s29 = sadd.s32 1, %s1379_s25  ;;  %s266_s30 = sadd.s32 1, %s1371_s23 }
  0x12   : > { %p53_p0 = scmp.ge.s32.totalorder %s51_s29, 2  ;;  %p276_p1 = scmp.ne.s32.totalorder %s1371_s23, %s1367_s22 }
  0x13   : > { %p277_p2 = scmp.eq.s32.totalorder %s1766_s27, 1  ;;  %p282_p3 = scmp.ne.s32.totalorder %s1367_s22, %s1363_s21 }
  0x14   : > { %s1796_s29 = smov (%p53_p0, %s51_s29), 0  ;;  %p283_p5 = scmp.eq.s32.totalorder %s1765_s28, 1 }
  0x15   : > { %p1503_p4 = por %p277_p2, %p276_p1  ;;  %s261_s14 = ssub.s32 %s1379_s25, %s1796_s29 }
  0x16   : > { %p1058_p6 = scmp.ge.s32.totalorder %s1383_s26, 1  ;;  %p264_p7 = scmp.eq.s32.totalorder %s261_s14, 0 }
  0x17   : > { %p1512_p8 = por %p283_p5, %p282_p3  ;;  %p429_p9 = scmp.lt.s32.totalorder %s1383_s26, 3 }
  0x18   : > { %s1518_s16 = scalar_select %p264_p7, %s1371_s23, %s266_s30  }
  0x19   : > { %p430_p10 = pnand %p1058_p6, %p429_p9 }
  0x1a   : > { %p496_p11 = scmp.lt.s32.totalorder (!%p430_p10), %s1375_s24, 1  ;;  %vm518_vm0 = vcmask (!%p430_p10), 261120   ;;  %s1778_s0 = sld [smem:[#allocation12_spill]] (!%p430_p10)  ;;  %v1206_v8 = vld [vmem:[%s1759_s7] sm:$0xff] (!%p430_p10)   ;;  %v1385_v9 = vmov (!%p430_p10), 0.0   ;;  %v1208_v11 = vld [vmem:[%s1759_s7 + $0x8] sm:$0xff] (!%p430_p10)  }
  0x1b   : > { %433 = sbr.rel (%p430_p10) target bundleno = 767 (0x2ff), region = 56  ;;  %s1779_s5 = sld [smem:[#allocation17_spill]] (!%p430_p10)  ;;  %1104 = vmatprep.subr.bf16.mxu0 (!%p430_p10), %v1385_v9  ;;  %1112 = vmatprep.subr.bf16.mxu1 (!%p430_p10), %v1385_v9  ;;  %vm1386_vm1 = vmmov (!%p430_p10), 0   ;;  %vm550_vm2 = vcmask (!%p430_p10), 257024   ;;  %v1070_v26 = vld [vmem:[%s1760_s8] ss:$0 sm:$0xff] (!%p430_p10) }
  0x1c   : > { %1113 = vmatpush3.bf16.msra.mxu1 (!%p430_p10), %v1206_v8  ;;  %1108 = vmatprep.mubr.msk.bf16.mxu0 (!%p430_p10), %vm1386_vm1, %v1385_v9  ;;  %s1780_s1 = sld [smem:[#allocation13_spill]] (!%p430_p10)  ;;  %s1545_s14 = sand.u32 (!%p430_p10), 1, %s1367_s22   ;;  %vm619_vm3 = vcmask (!%p430_p10), 60416  }
  0x1d   : > { %1114 = vmatprep.subr.bf16.mxu1 (!%p430_p10), %v1385_v9  ;;  %1116 = vmatprep.mubr.msk.bf16.mxu1 (!%p430_p10), %vm1386_vm1, %v1385_v9  ;;  %s1781_s2 = sld [smem:[#allocation14_spill]] (!%p430_p10)  ;;  %s1782_s3 = sld [smem:[#allocation15_spill]] (!%p430_p10) }
  0x1e   : > { %s1783_s6 = sld [smem:[#allocation18_spill]] (!%p430_p10)  ;;  %s1784_s4 = sld [smem:[#allocation16_spill]] (!%p430_p10) }
  0x1f   : > { %s1587_s20 = sshll.u32 (!%p430_p10), %s1375_s24, 6  ;;  %s1387_s19 = smov (!%p430_p10), [#allocation2]  }
  0x20   : > { %1115 = vmatpush3.bf16.msra.mxu1 (!%p430_p10), %v1208_v11  ;;  %s1217_s30 = sshll.u32 (!%p430_p10), %s1387_s19, 4  ;;  %s1218_s30 = int_to_ptr.vmem [resolvable:$false] %s1217_s30 }
  0x21   : > { %v1205_v7 = vld [vmem:[%s1779_s5] sm:$0xff] (!%p430_p10)   ;;  %v1207_v10 = vld [vmem:[%s1779_s5 + $0x8] sm:$0xff] (!%p430_p10)  }
  0x22   : > { %s497_s17 = scalar_select %p496_p11, %s1375_s24, 1  ;;  %1105 = vmatpush3.bf16.msra.mxu0 %v1205_v7  ;;  %v1064_v16 = vld [vmem:[%s1780_s1] ss:$0 sm:$0xff] }
  0x23   : > { %1106 = vmatprep.subr.bf16.mxu0 %v1385_v9  ;;  %v1065_v18 = vld [vmem:[%s1781_s2] ss:$0 sm:$0xff]  ;;  %v1210_v23 = vld [vmem:[%s1782_s3 + $0x8] sm:$0xff]   ;;  %s1219_s1 = scalar_lea.vmem %s1218_s30, 128 }
  0x24   : > { %s1063_s18 = sshll.u32 %s497_s17, 3  ;;  %v1209_v21 = vld [vmem:[%s1782_s3] sm:$0xff]   ;;  %s1593_s3 = scalar_lea.hbm %s1761_s9, %s1587_s20 }
  0x25   : > { %s502_s28 = scalar_lea.vmem %s1778_s0, %s1063_s18  ;;  %s1551_s18 = sshll.u32 %s1545_s14, 2  ;;  %v1066_v25 = vld [vmem:[%s1783_s6] ss:$0 sm:$0xff] }
  0x26   : > { %v517_v0 = vld [vmem:[%s502_s28] sm:$0xff]  ;;  %1107 = vmatpush3.bf16.msra.mxu0 %v1207_v10  ;;  %s1559_s27 = scalar_lea.vmem [#allocation2], %s1551_s18  ;;  %s1767_s0 = scalar_lea.vmem [#allocation6], %s1551_s18 }
  0x27   : > { %v519_v1 = vsel %vm518_vm0, %v517_v0, 0.0  ;;  %1120 = vmatprep.subr.bf16.mxu0 %v1385_v9  ;;  %s1768_s17 = scalar_lea.vmem [#allocation7], %s1551_s18  ;;  %v1074_v39 = vld [vmem:[%s1784_s4] ss:$0 sm:$0xff]  ;;  %s805_s5 = sshll.u32 %s1559_s27, 4  ;;  %s1596_s5 = int_to_ptr.vmem [resolvable:$true] %s805_s5 }
  0x28   : > { %520 = vadd.xlane.f32.xlu0 %v519_v1  ;;  %s1213_s28 = scalar_lea.vmem %s1596_s5, 64  ;;  %p1220_p1 = scmp.lt.s32.totalorder %s1596_s5, %s1218_s30 }
  0x29   : > { %p1214_p12 = scmp.ne.s32.totalorder %s1596_s5, %s1213_s28  ;;  %p1221_p2 = scmp.lt.s32.totalorder %s1219_s1, %s1213_s28 }
  0x2b   : > { %p1215_p13 = pnand %p1214_p12, %p1503_p4  ;;  %p1222_p3 = por %p1221_p2, %p1220_p1 }
  0x2d   : > { %p1216_p0 = pneg %p1215_p13 }
  0x2f   : > { %p1223_p5 = pnand %p1222_p3, %p1216_p0 }
  0xb5   : > { %v521_v2 = vpop.xlane.xlu0 %520 }
  0xb6   : > { %v523_v3 = vmul.f32 0.03125, %v521_v2 }
  0xb8   : > { %v524_v4 = vsub.f32 %v517_v0, %v523_v3 }
  0xba   : > { %v525_v5 = vmul.f32 %v524_v4, %v524_v4 }
  0xbc   : > { %v526_v6 = vsel %vm518_vm0, %v525_v5, 0.0 }
  0xbd   : > { %527 = vadd.xlane.f32.xlu0 %v526_v6 }
 0x14a   : > { %v528_v12 = vpop.xlane.xlu0 %527 }
 0x14b   : > { %v529_v13 = vmul.f32 0.03125, %v528_v12 }
 0x14d   : > { %v530_v14 = vadd.f32 1e-05, %v529_v13 }
 0x14f   : > { %1211 = vrsqrt.f32 %v530_v14 }
 0x159   : > { %v1212_v15 = vpop.eup %1211 }
 0x15a   : > { %v532_v17 = vmul.f32 %v1212_v15, %v524_v4 }
 0x15c   : > { %v540_v19 = vmul.f32 %v1064_v16, %v532_v17 }
 0x15e   : > { %v548_v20 = vadd.f32 %v1065_v18, %v540_v19 }
 0x160   : > { %v549_v22 = vpack.c.bf16 %v548_v20, %v548_v20 }
 0x162   : > { %1109 = vmatmul.mubr.msk.bf16.vlgmr.msra.gmra.mrb[0].mxu0 %vm518_vm0, %v549_v22  ;;  %1117 = vmatmul.mubr.msk.bf16.vlgmr.msra.gmra.mrb[0].mxu1 %vm518_vm0, %v549_v22  ;;  %551 = vst.msk [vmem:[%s1559_s27] sm:$0xf] %vm550_vm2, %v549_v22 }
 0x163   : > { %1121 = vmatpush3.bf16.msra.mxu0 %v1209_v21  ;;  %1124 = vmatprep.mubr.msk.bf16.mxu0 %vm1386_vm1, %v1385_v9 }
 0x164   : > { %1122 = vmatprep.subr.bf16.mxu0 %v1385_v9 }
 0x167   : > { %1123 = vmatpush3.bf16.msra.mxu0 %v1210_v23 }
 0x169   : > { %v686_v24 = vld [vmem:[%s1559_s27] sm:$0xf] }
 0x16a   : > { %1125 = vmatmul.mubr.msk.bf16.vlgmr.msra.gmra.mrb[4].mxu0 %vm518_vm0, %v686_v24 }
 0x235   : > { %v612_v27 = vpop.f32.mrb[0].mxu0  ;;  %v678_v28 = vpop.f32.mrb[0].mxu1 }
 0x236   : > { %v613_v29 = vadd.f32 %v1066_v25, %v612_v27  ;;  %v679_v30 = vadd.f32 %v1070_v26, %v678_v28  ;;  %v1110_v31 = vpop.f32.mrb[1].mxu0  ;;  %v1118_v32 = vpop.f32.mrb[1].mxu1 }
 0x237   : > { %v615_v33 = vpop.f32.mrb[2].mxu0  ;;  %v681_v34 = vpop.f32.mrb[2].mxu1 }
 0x238   : > { %v618_v35 = vpack.c.bf16 %v613_v29, %v613_v29  ;;  %v684_v36 = vpack.c.bf16 %v679_v30, %v679_v30  ;;  %v1111_v37 = vpop.f32.mrb[3].mxu0  ;;  %v1119_v38 = vpop.f32.mrb[3].mxu1 }
 0x23a   : > { %620 = vst.msk [vmem:[%s1767_s0] sm:$0xf] %vm619_vm3, %v618_v35  ;;  %685 = vst.msk [vmem:[%s1768_s17] sm:$0xf] %vm619_vm3, %v684_v36  ;;  %s776_s0 = scalar_lea.sflag [#allocation3], %s1545_s14 }
 0x23d   : > { %v748_v40 = vpop.f32.mrb[4].mxu0 }
 0x23e   : > { %v749_v41 = vadd.f32 %v1074_v39, %v748_v40  ;;  %v1126_v42 = vpop.f32.mrb[5].mxu0 }
 0x23f   : > { %1226 = shalt.err (!%p1223_p5)
}
 0x240   : > { %s1227_s2 = scalar_lea.hbm %s1593_s3, 64  ;;  %s1231_s19 = scalar_lea.hbm %s1761_s9, 128 }
 0x241   : > { %p1228_p6 = scmp.ne.s32.totalorder %s1593_s3, %s1227_s2  ;;  %p1232_p10 = scmp.lt.u32.totalorder %s1593_s3, %s1761_s9 }
 0x242   : > { %p1233_p11 = scmp.lt.u32.totalorder %s1231_s19, %s1227_s2  ;;  %p1235_p13 = scmp.lt.u32.totalorder %s1227_s2, %s1593_s3 }
 0x243   : > { %p1229_p7 = pnand %p1228_p6, %p1503_p4 }
 0x244   : > { %p1234_p12 = por %p1233_p11, %p1232_p10 }
 0x245   : > { %p1230_p9 = pneg %p1229_p7 }
 0x246   : > { %p1236_p0 = por %p1235_p13, %p1234_p12 }
 0x248   : > { %p1237_p1 = pnand %p1236_p0, %p1230_p9 }
 0x24a   : > { %1240 = shalt.err (!%p1237_p1)
}
 0x24b   : > { %1128 = dma.vmem_to_hbm [thread:$0]  (%p1503_p4), %s1596_s5, 64, %s1593_s3, %s776_s0   ;;  %v751_v43 = vpop.f32.mrb[6].mxu0  ;;  %v754_v44 = vpack.c.bf16 %v749_v41, %v749_v41 }
 0x24c   : > { %v1127_v45 = vpop.f32.mrb[7].mxu0  ;;  %s1624_s28 = scalar_lea.hbm %s1764_s12, %s1587_s20  ;;  %s1785_s1 = scalar_lea.vmem [#allocation7], %s1551_s18 }
 0x24d   : > { %s852_s2 = sshll.u32 %s1785_s1, 4  ;;  %s1388_s27 = smov 104   ;;  %s853_s2 = int_to_ptr.vmem [resolvable:$true] %s852_s2 }
 0x24e   : > { %770 = vrot.lane.b32.xlu0 %v754_v44, %s1388_s27  ;;  %s1389_s19 = smov 120   ;;  %s1786_s30 = sshll.u32 %s1545_s14, 4 }
 0x24f   : > { %760 = vrot.lane.b32.xlu1 %v754_v44, %s1389_s19  ;;  %s1630_s6 = scalar_lea.vmem [#allocation4], %s1786_s30  ;;  %s791_s3 = scalar_lea.sflag [#allocation8], %s1545_s14 }
 0x250   : > { %756 = vst.msk [vmem:[%s1630_s6] sm:$0xf] %vm619_vm3, %v754_v44  ;;  %s1241_s5 = scalar_lea.vmem %s853_s2, 64  ;;  %s1390_s0 = smov [#allocation7]  }
 0x251   : > { %p1242_p2 = scmp.ne.s32.totalorder %s853_s2, %s1241_s5  ;;  %s1245_s4 = sshll.u32 %s1390_s0, 4  ;;  %s1246_s4 = int_to_ptr.vmem [resolvable:$false] %s1245_s4 }
 0x252   : > { %s1247_s17 = scalar_lea.vmem %s1246_s4, 128  ;;  %p1248_p6 = scmp.lt.s32.totalorder %s853_s2, %s1246_s4 }
 0x253   : > { %p1243_p3 = pnand %p1242_p2, %p1503_p4  ;;  %p1249_p7 = scmp.lt.s32.totalorder %s1247_s17, %s1241_s5 }
 0x255   : > { %p1244_p5 = pneg %p1243_p3  ;;  %p1250_p9 = por %p1249_p7, %p1248_p6 }
 0x257   : > { %p1251_p10 = pnand %p1250_p9, %p1244_p5 }
 0x259   : > { %1254 = shalt.err (!%p1251_p10)
}
 0x25a   : > { %s1255_s14 = scalar_lea.hbm %s1624_s28, 64  ;;  %s1259_s19 = scalar_lea.hbm %s1764_s12, 128 }
 0x25b   : > { %p1256_p11 = scmp.ne.s32.totalorder %s1624_s28, %s1255_s14  ;;  %p1260_p0 = scmp.lt.u32.totalorder %s1624_s28, %s1764_s12 }
 0x25c   : > { %p1261_p1 = scmp.lt.u32.totalorder %s1259_s19, %s1255_s14  ;;  %p1263_p3 = scmp.lt.u32.totalorder %s1255_s14, %s1624_s28 }
 0x25d   : > { %p1257_p12 = pnand %p1256_p11, %p1503_p4 }
 0x25e   : > { %p1262_p2 = por %p1261_p1, %p1260_p0 }
 0x25f   : > { %p1258_p13 = pneg %p1257_p12 }
 0x260   : > { %p1264_p5 = por %p1263_p3, %p1262_p2 }
 0x262   : > { %p1265_p6 = pnand %p1264_p5, %p1258_p13 }
 0x264   : > { %1268 = shalt.err (!%p1265_p6)
}
 0x265   : > { %1131 = dma.vmem_to_hbm [thread:$0]  (%p1503_p4), %s853_s2, 64, %s1624_s28, %s791_s3  }
 0x266   : > { %s1391_s5 = smov 112   ;;  %s821_s4 = sshll.u32 %s1630_s6, 4  ;;  %s1658_s4 = int_to_ptr.vmem [resolvable:$true] %s821_s4 }
 0x267   : > { %765 = vrot.lane.b32.xlu1 %v754_v44, %s1391_s5  ;;  %s1787_s17 = sadd.s32 4294967295, %s1383_s26   ;;  %s1094_s1 = sshll.u32 %s1375_s24, 8 }
 0x268   : > { %s1655_s14 = sand.u32 1, %s1787_s17   ;;  %s1788_s28 = scalar_lea.vmem [#allocation6], %s1551_s18 }
 0x269   : > { %s838_s2 = sshll.u32 %s1788_s28, 4  ;;  %s1669_s19 = scalar_lea.hbm %s1762_s10, %s1094_s1  ;;  %s1677_s2 = int_to_ptr.vmem [resolvable:$true] %s838_s2 }
 0x26a   : > { %s1675_s0 = scalar_lea.hbm %s1763_s11, %s1587_s20  ;;  %s781_s5 = scalar_lea.sflag [#allocation5], %s1655_s14 }
 0x26b   : > { %s1269_s17 = scalar_lea.vmem %s1658_s4, 256  ;;  %s1392_s18 = smov [#allocation4]  }
 0x26c   : > { %p1270_p7 = scmp.ne.s32.totalorder %s1658_s4, %s1269_s17  ;;  %s1273_s28 = sshll.u32 %s1392_s18, 4  ;;  %s1274_s28 = int_to_ptr.vmem [resolvable:$false] %s1273_s28 }
 0x26d   : > { %s1275_s1 = scalar_lea.vmem %s1274_s28, 512  ;;  %p1276_p11 = scmp.lt.s32.totalorder %s1658_s4, %s1274_s28 }
 0x26e   : > { %p1271_p9 = pnand %p1270_p7, %p1503_p4  ;;  %p1277_p12 = scmp.lt.s32.totalorder %s1275_s1, %s1269_s17 }
 0x270   : > { %p1272_p10 = pneg %p1271_p9  ;;  %p1278_p13 = por %p1277_p12, %p1276_p11 }
 0x272   : > { %p1279_p0 = pnand %p1278_p13, %p1272_p10 }
 0x2c0   : > { %v771_v46 = vpop.permute.xlu0 %770 }
 0x2c1   : > { %v761_v47 = vpop.permute.xlu1 %760  ;;  %1081 = vst.msk [vmem:[%s1630_s6 + $0xc] sm:$0xf] %vm619_vm3, %v771_v46 }
 0x2c2   : > { %1079 = vst.msk [vmem:[%s1630_s6 + $0x4] sm:$0xf] %vm619_vm3, %v761_v47 }
 0x2d9   : > { %v766_v48 = vpop.permute.xlu1 %765 }
 0x2da   : > { %1080 = vst.msk [vmem:[%s1630_s6 + $0x8] sm:$0xf] %vm619_vm3, %v766_v48 }
 0x2db   : > { %1282 = shalt.err (!%p1279_p0)
}
 0x2dc   : > { %s1283_s6 = scalar_lea.hbm %s1669_s19, 256  ;;  %s1287_s27 = scalar_lea.hbm %s1762_s10, 512 }
 0x2dd   : > { %p1284_p1 = scmp.ne.s32.totalorder %s1669_s19, %s1283_s6  ;;  %p1288_p5 = scmp.lt.u32.totalorder %s1669_s19, %s1762_s10 }
 0x2de   : > { %p1289_p6 = scmp.lt.u32.totalorder %s1287_s27, %s1283_s6  ;;  %p1291_p9 = scmp.lt.u32.totalorder %s1283_s6, %s1669_s19 }
 0x2df   : > { %p1285_p2 = pnand %p1284_p1, %p1503_p4 }
 0x2e0   : > { %p1290_p7 = por %p1289_p6, %p1288_p5 }
 0x2e1   : > { %p1286_p3 = pneg %p1285_p2 }
 0x2e2   : > { %p1292_p10 = por %p1291_p9, %p1290_p7 }
 0x2e4   : > { %p1293_p11 = pnand %p1292_p10, %p1286_p3 }
 0x2e6   : > { %1296 = shalt.err (!%p1293_p11)
}
 0x2e7   : > { %s1393_s17 = smov 64   ;;  %s1394_s18 = smov 4  }
 0x2e8   : > { %1129 = dma.vmem_to_hbm [thread:$0]  (%p1503_p4), %s1658_s4, 256, %s1669_s19, %s781_s5, %s1393_s17, %s1393_s17, %s1394_s18  }
 0x2e9   : > { %s1297_s28 = scalar_lea.vmem %s1677_s2, 64  ;;  %s1395_s1 = smov [#allocation6]  }
 0x2ea   : > { %p1298_p12 = scmp.ne.s32.totalorder %s1677_s2, %s1297_s28  ;;  %s1301_s6 = sshll.u32 %s1395_s1, 4  ;;  %s1302_s6 = int_to_ptr.vmem [resolvable:$false] %s1301_s6 }
 0x2eb   : > { %s1303_s20 = scalar_lea.vmem %s1302_s6, 128  ;;  %p1304_p1 = scmp.lt.s32.totalorder %s1677_s2, %s1302_s6 }
 0x2ec   : > { %p1299_p13 = pnand %p1298_p12, %p1503_p4  ;;  %p1305_p2 = scmp.lt.s32.totalorder %s1303_s20, %s1297_s28 }
 0x2ee   : > { %p1300_p0 = pneg %p1299_p13  ;;  %p1306_p3 = por %p1305_p2, %p1304_p1 }
 0x2f0   : > { %p1307_p5 = pnand %p1306_p3, %p1300_p0 }
 0x2f2   : > { %1310 = shalt.err (!%p1307_p5)
}
 0x2f3   : > { %s1311_s4 = scalar_lea.hbm %s1675_s0, 64  ;;  %s1315_s27 = scalar_lea.hbm %s1763_s11, 128 }
 0x2f4   : > { %p1312_p6 = scmp.ne.s32.totalorder %s1675_s0, %s1311_s4  ;;  %p1316_p10 = scmp.lt.u32.totalorder %s1675_s0, %s1763_s11 }
 0x2f5   : > { %p1317_p11 = scmp.lt.u32.totalorder %s1315_s27, %s1311_s4  ;;  %p1319_p13 = scmp.lt.u32.totalorder %s1311_s4, %s1675_s0 }
 0x2f6   : > { %p1313_p7 = pnand %p1312_p6, %p1503_p4 }
 0x2f7   : > { %p1318_p12 = por %p1317_p11, %p1316_p10 }
 0x2f8   : > { %p1314_p9 = pneg %p1313_p7 }
 0x2f9   : > { %p1320_p0 = por %p1319_p13, %p1318_p12 }
 0x2fb   : > { %p1321_p1 = pnand %p1320_p0, %p1314_p9 }
 0x2fd   : > { %1324 = shalt.err (!%p1321_p1)
}
 0x2fe   : > { %1130 = dma.vmem_to_hbm [thread:$0]  (%p1503_p4), %s1677_s2, 64, %s1675_s0, %s781_s5  }
 0x2ff PF: > { %p1149_p2 = scmp.ge.s32.totalorder %s1383_s26, 2  ;;  %s864_s17 = sand.u32 1, %s1363_s21  }
 0x300   : > { %s865_s18 = scalar_lea.sflag [#allocation3], %s864_s17 }
 0x301   : > { %p1137_p3 = pnand %p1149_p2, %p1512_p8 }
 0x303   : > { %1350 = dma.done.wait (!%p1137_p3), %s865_s18, 64  }
 0x304   : > { %1352 = vsyncadd (!%p1137_p3), %s865_s18, 4294967232  ;;  %s1789_s28 = sadd.s32 4294967294, %s1383_s26  }
 0x305   : > { %s873_s1 = sand.u32 1, %s1789_s28  }
 0x306   : > { %s874_s13 = scalar_lea.sflag [#allocation5], %s873_s1 }
 0x307   : > { %1354 = dma.done.wait (!%p1137_p3), %s874_s13, 320  }
 0x308   : > { %1356 = vsyncadd (!%p1137_p3), %s874_s13, 4294966976  ;;  %s892_s14 = scalar_lea.sflag [#allocation8], %s864_s17 }
 0x309   : > { %1358 = dma.done.wait (!%p1137_p3), %s892_s14, 64  }
 0x30a   : > { %1360 = vsyncadd (!%p1137_p3), %s892_s14, 4294967232  ;;  %s32_s26 = sadd.s32 1, %s1383_s26   ;;  %s1790_s21 = smov %s1367_s22 }
 0x30b   : > { %p29_p4 = scmp.ge.s32.totalorder %s32_s26, 4   ;;  %s1791_s22 = smov %s1371_s23 }
 0x30c   : > { %s1792_s23 = smov %s1518_s16  ;;  %s1793_s24 = smov %s1379_s25 }
 0x30d   : > { %s1794_s25 = smov %s1796_s29  ;;  %31 = sbr.rel (!%p29_p4) target bundleno = 16 (0x10), region = 153 }
 0x314   :  { %897 = vsyncpa [#allocation3], 1 }
 0x315   :  { %899 = vsyncpa [#allocation3 + $0x1], 1 }
 0x316   :  { %900 = vsyncpa [#allocation5], 1 }
 0x317   :  { %902 = vsyncpa [#allocation5 + $0x1], 1 }
 0x318   :  { %903 = vsyncpa [#allocation8], 1 }
 0x319   :  { %905 = vsyncpa [#allocation8 + $0x1], 1 }

</bundles_post_ra>
